<compile_context>
chip_gen: v7x
topology: tpu7x:2x2x1
jax: 0.10.0
libtpu: 0.0.40
codegen_flags: <defaults>
</compile_context>

<pallas_src>
import functools
from typing import NamedTuple, Optional

import jax
import jax.numpy as jnp
from jax.experimental import pallas as pl
from jax.experimental.pallas import tpu as pltpu


# --------------------------------------------------------------------------
# Small helpers
# --------------------------------------------------------------------------
def _round_up(x, m):
    return ((x + m - 1) // m) * m


def _largest_aligned_divisor(total, target, unit=128):
    """Largest multiple of `unit` that divides `total` and is <= target."""
    total_units = total // unit
    target_units = max(1, min(target // unit, total_units))
    best = 1
    for d in range(1, total_units + 1):
        if total_units % d == 0 and d <= target_units:
            best = d
    return best * unit


def _fit_tm(bytes_fn, tm0, sublane, limit):
    """Halve the row tile until the VMEM footprint model fits the budget."""
    t = tm0
    while t > sublane and bytes_fn(t) > limit:
        t = max(sublane, _round_up(t // 2, sublane))
    return t


def _pad2(a, rows, cols):
    pr, pc = rows - a.shape[0], cols - a.shape[1]
    if pr == 0 and pc == 0:
        return a
    return jnp.pad(a, ((0, pr), (0, pc)))


def _tpu_defaults():
    """Generation-aware (row-tile default, vmem limit, vmem capacity)."""
    kind = ""
    try:
        kind = jax.devices()[0].device_kind.lower()
    except Exception:
        pass
    vmem_cap = None
    try:
        info = pltpu.get_tpu_info()
        vmem_cap = getattr(info, "vmem_capacity_bytes", None)
    except Exception:
        vmem_cap = None
    if vmem_cap is None:
        # v5e / v6e have 128 MiB per TensorCore; assume 64 MiB otherwise (v7x).
        vmem_cap = 128 * 1024 * 1024 if ("v5" in kind or "v6" in kind) else 64 * 1024 * 1024
    # Roofline crossover on weight bytes: ~640 FLOP/byte on v6e -> tm ~1024;
    # ~240-310 on v5e / v7x -> tm ~512.
    tm_default = 1024 if "v6" in kind else 512
    # Never hand the compiler the whole physical VMEM: leave headroom for
    # internal scratch / pipelining (v7x: ~48 MiB; v5e/v6e: ~96-100 MiB).
    vmem_limit = int(min(vmem_cap * 3 // 4, 100 * 1024 * 1024))
    return tm_default, vmem_limit, int(vmem_cap)


def _weight_spec(shape, index_map, deep_buffer):
    if deep_buffer:
        try:
            return pl.BlockSpec(shape, index_map, pipeline_mode=pl.Buffered(3))
        except TypeError:  # pipeline_mode unavailable in this jax version
            pass
    return pl.BlockSpec(shape, index_map)


# --------------------------------------------------------------------------
# Kernels
# --------------------------------------------------------------------------
def _ffn_resident_kernel(x_ref, w1_ref, b1_ref, w2_ref, b2_ref, o_ref):
    # Weights fully resident in VMEM: single pass per row tile, no reduction
    # axis, no accumulator.
    x = x_ref[...]  # native / compute dtype straight to the MXU
    h = jnp.dot(x, w1_ref[...], preferred_element_type=jnp.float32)
    h = jnp.maximum(h + b1_ref[...].astype(jnp.float32), 0.0)
    h = h.astype(x.dtype)  # one down-cast so fc_2 runs at native MXU rate
    y = jnp.dot(h, w2_ref[...], preferred_element_type=jnp.float32)
    o_ref[...] = (y + b2_ref[...].astype(jnp.float32)).astype(o_ref.dtype)


def _ffn_streamed_kernel(x_ref, w1_ref, b1_ref, w2_ref, b2_ref, o_ref, *scratch):
    # Weights streamed in pf chunks.  If the output dtype is f32 we accumulate
    # directly into the (VMEM-resident) output block; otherwise a dedicated
    # f32 scratch accumulator is supplied.
    acc_ref = scratch[0] if scratch else o_ref
    k = pl.program_id(1)

    x = x_ref[...]
    h = jnp.dot(x, w1_ref[...], preferred_element_type=jnp.float32)
    h = jnp.maximum(h + b1_ref[...].astype(jnp.float32), 0.0)
    h = h.astype(x.dtype)
    part = jnp.dot(h, w2_ref[...], preferred_element_type=jnp.float32)

    @pl.when(k == 0)
    def _():
        acc_ref[...] = part          # write, not zero-init + add

    @pl.when(k > 0)
    def _():
        acc_ref[...] = acc_ref[...] + part

    @pl.when(k == pl.num_programs(1) - 1)
    def _():
        o_ref[...] = (acc_ref[...] + b2_ref[...].astype(jnp.float32)).astype(o_ref.dtype)


# --------------------------------------------------------------------------
# Static configuration (derived from shapes + hardware, hashable for jit)
# --------------------------------------------------------------------------
class _FFNConfig(NamedTuple):
    tm: int
    tpf: int
    hid_p: int
    pf_p: int
    M_pad: int
    resident: bool
    deep_buffer: bool
    vmem_limit: int
    compute_dtype: Optional[str]


def _make_config(x_shape, x_dtype, w1_shape, tm, tpf, compute_dtype, force_streamed):
    hid = x_shape[-1]
    pf = w1_shape[1]
    M = 1
    for d in x_shape[:-1]:
        M *= d
    M = max(M, 1)

    out_dt = jnp.dtype(x_dtype).itemsize
    cdt = jnp.dtype(compute_dtype) if compute_dtype is not None else jnp.dtype(x_dtype)
    dt = cdt.itemsize
    sublane = max(8, 32 // dt)  # 8 for f32, 16 for bf16, 32 for int8

    hid_p = _round_up(hid, 128)
    pf_p = _round_up(pf, 128)

    tm_default, vmem_limit, vmem_cap = _tpu_defaults()
    tm_target = tm if tm is not None else tm_default
    tm_target = max(sublane, _round_up(tm_target, sublane))

    M_min = _round_up(M, sublane)
    if M_min <= tm_target:
        # Whole token dim fits one tile; split into two when possible so the
        # "parallel" row axis can shard across both v7x TensorCores.
        if M_min >= 2 * sublane:
            tm_eff = _round_up((M_min + 1) // 2, sublane)
        else:
            tm_eff = M_min
    else:
        tm_eff = tm_target

    # pf chunk = largest 128-multiple divisor of pf_p <= target: no padded
    # MXU work / weight DMA beyond the 128 lane alignment.  Decode-ish calls
    # (small M) use bigger chunks to amortize per-grid-step overhead.
    tpf_target = tpf if tpf is not None else (2048 if M <= 256 else 1024)
    tpf_eff = _largest_aligned_divisor(pf_p, tpf_target)

    def resident_bytes(t):
        return (2 * t * hid_p * dt                         # x tiles (dbl buf)
                + 2 * t * hid_p * out_dt                   # out tiles
                + 2 * (2 * hid_p * pf_p + pf_p + hid_p) * dt   # weights (pessimistic 2x)
                + t * pf_p * (4 + dt))                     # fc_1 intermediate

    def streamed_bytes(t, nbuf):
        return (2 * t * hid_p * dt
                + 2 * t * hid_p * out_dt
                + nbuf * (2 * hid_p * tpf_eff + tpf_eff + hid_p) * dt
                + t * hid_p * 4                            # f32 accumulator (worst case)
                + t * tpf_eff * (4 + dt))

    resident = (not force_streamed) and resident_bytes(min(tm_eff, 256)) <= vmem_limit
    if resident:
        tm_final = _fit_tm(resident_bytes, tm_eff, sublane, vmem_limit)
        deep_buffer = False
    else:
        grid_k = pf_p // tpf_eff
        deep_buffer = (vmem_cap >= 100 * 1024 * 1024) and grid_k >= 3
        nbuf = 3 if deep_buffer else 2
        tm_final = _fit_tm(lambda t: streamed_bytes(t, nbuf), tm_eff, sublane, vmem_limit)

    M_pad = _round_up(M, tm_final)

    return _FFNConfig(
        tm=tm_final, tpf=tpf_eff, hid_p=hid_p, pf_p=pf_p, M_pad=M_pad,
        resident=resident, deep_buffer=deep_buffer, vmem_limit=vmem_limit,
        compute_dtype=(str(jnp.dtype(compute_dtype)) if compute_dtype is not None else None),
    )


# --------------------------------------------------------------------------
# Jitted implementation
# --------------------------------------------------------------------------
@functools.partial(jax.jit, static_argnames=("cfg",))
def _ffn_impl(x, w1, b1, w2, b2, cfg):
    orig_shape = x.shape
    hid = orig_shape[-1]
    pf = w1.shape[1]
    M = 1
    for d in orig_shape[:-1]:
        M *= d

    out_dtype = x.dtype
    out_dt_bytes = jnp.dtype(out_dtype).itemsize

    x2 = x.reshape(M, hid)
    if cfg.compute_dtype is not None:
        cdt = jnp.dtype(cfg.compute_dtype)
        x2 = x2.astype(cdt)
        w1 = w1.astype(cdt)
        w2 = w2.astype(cdt)
    dt_bytes = jnp.dtype(x2.dtype).itemsize

    # Zero padding (skipped when already aligned).  Zero pf-columns of w1 and
    # zero b1 entries stay zero through ReLU and meet zero rows of w2, so they
    # contribute nothing; padded rows / hid columns are sliced off below.
    # NOTE: for repeated inference, pad the weights once outside this call.
    x2 = _pad2(x2, cfg.M_pad, cfg.hid_p)
    w1p = _pad2(w1, cfg.hid_p, cfg.pf_p)
    b1p = _pad2(b1.reshape(1, -1), 1, cfg.pf_p)
    w2p = _pad2(w2, cfg.pf_p, cfg.hid_p)
    b2p = _pad2(b2.reshape(1, -1), 1, cfg.hid_p)

    grid_m = cfg.M_pad // cfg.tm
    weight_bytes = (2 * cfg.hid_p * cfg.pf_p + cfg.pf_p + cfg.hid_p) * dt_bytes
    io_bytes = cfg.M_pad * cfg.hid_p * (dt_bytes + out_dt_bytes)
    flops = 4 * M * hid * pf  # two matmuls, 2*M*hid*pf each

    if cfg.resident:
        cost = pl.CostEstimate(flops=flops, transcendentals=0,
                               bytes_accessed=io_bytes + weight_bytes)
        out2 = pl.pallas_call(
            _ffn_resident_kernel,
            out_shape=jax.ShapeDtypeStruct((cfg.M_pad, cfg.hid_p), out_dtype),
            grid_spec=pltpu.PrefetchScalarGridSpec(
                num_scalar_prefetch=0,
                grid=(grid_m,),
                in_specs=[
                    pl.BlockSpec((cfg.tm, cfg.hid_p), lambda i: (i, 0)),     # x tile
                    pl.BlockSpec((cfg.hid_p, cfg.pf_p), lambda i: (0, 0)),   # w1 (resident)
                    pl.BlockSpec((1, cfg.pf_p), lambda i: (0, 0)),           # b1
                    pl.BlockSpec((cfg.pf_p, cfg.hid_p), lambda i: (0, 0)),   # w2 (resident)
                    pl.BlockSpec((1, cfg.hid_p), lambda i: (0, 0)),          # b2
                ],
                out_specs=pl.BlockSpec((cfg.tm, cfg.hid_p), lambda i: (i, 0)),
            ),
            compiler_params=pltpu.CompilerParams(
                dimension_semantics=("parallel",),
                vmem_limit_bytes=cfg.vmem_limit,
            ),
            cost_estimate=cost,
        )(x2, w1p, b1p, w2p, b2p)
    else:
        grid_k = cfg.pf_p // cfg.tpf
        # Account for weight re-streaming (read once per row tile).
        cost = pl.CostEstimate(flops=flops, transcendentals=0,
                               bytes_accessed=io_bytes + grid_m * weight_bytes)
        # f32 outputs accumulate directly into the resident output block.
        needs_scratch = jnp.dtype(out_dtype) != jnp.float32
        scratch = ([pltpu.VMEM((cfg.tm, cfg.hid_p), jnp.float32)]
                   if needs_scratch else [])
        out2 = pl.pallas_call(
            _ffn_streamed_kernel,
            out_shape=jax.ShapeDtypeStruct((cfg.M_pad, cfg.hid_p), out_dtype),
            grid_spec=pltpu.PrefetchScalarGridSpec(
                num_scalar_prefetch=0,
                grid=(grid_m, grid_k),
                in_specs=[
                    pl.BlockSpec((cfg.tm, cfg.hid_p), lambda i, k: (i, 0)),       # x tile
                    _weight_spec((cfg.hid_p, cfg.tpf), lambda i, k: (0, k),
                                 cfg.deep_buffer),                                # w1 chunk
                    pl.BlockSpec((1, cfg.tpf), lambda i, k: (0, k)),              # b1 chunk
                    _weight_spec((cfg.tpf, cfg.hid_p), lambda i, k: (k, 0),
                                 cfg.deep_buffer),                                # w2 chunk
                    pl.BlockSpec((1, cfg.hid_p), lambda i, k: (0, 0)),            # b2
                ],
                out_specs=pl.BlockSpec((cfg.tm, cfg.hid_p), lambda i, k: (i, 0)),
                scratch_shapes=scratch,
            ),
            compiler_params=pltpu.CompilerParams(
                dimension_semantics=("parallel", "arbitrary"),
                vmem_limit_bytes=cfg.vmem_limit,
            ),
            cost_estimate=cost,
        )(x2, w1p, b1p, w2p, b2p)

    if cfg.M_pad != M or cfg.hid_p != hid:
        out2 = out2[:M, :hid]
    return out2.reshape(orig_shape)


def positionwise_feedforward(x, w1, b1, w2, b2, *, tm=None, tpf=None,
                             compute_dtype=None, force_streamed=False):
    """x: [..., hid] -> [..., hid].  Weights stored as [in, out] (x @ W),
    i.e. the transpose of PyTorch nn.Linear's [out, in] storage."""
    cfg = _make_config(x.shape, x.dtype, w1.shape, tm, tpf, compute_dtype,
                       force_streamed)
    return _ffn_impl(x, w1, b1, w2, b2, cfg)


# --------------------------------------------------------------------------
# Reference + test
# --------------------------------------------------------------------------
def reference_ffn(x, w1, b1, w2, b2):
    h = jnp.maximum(jnp.einsum("...h,hp->...p", x, w1) + b1, 0.0)
    return jnp.einsum("...p,ph->...h", h, w2) + b2


if __name__ == "__main__":
    batch, seq = 2, 8
    hid_dim, pf_dim = 32, 64
    dropout = 0.1  # inference mode -> identity

    key = jax.random.PRNGKey(0)
    kx, kw1, kb1, kw2, kb2 = jax.random.split(key, 5)

    x = jax.random.normal(kx, (batch, seq, hid_dim), dtype=jnp.float32)
    w1 = jax.random.normal(kw1, (hid_dim, pf_dim), dtype=jnp.float32) * 0.05
    b1 = jax.random.normal(kb1, (pf_dim,), dtype=jnp.float32) * 0.05
    w2 = jax.random.normal(kw2, (pf_dim, hid_dim), dtype=jnp.float32) * 0.05
    b2 = jax.random.normal(kb2, (hid_dim,), dtype=jnp.float32) * 0.05

    # 1) Default path (weights fully resident in VMEM at these sizes).
    y = jax.block_until_ready(positionwise_feedforward(x, w1, b1, w2, b2))
    y_ref = reference_ffn(x, w1, b1, w2, b2)
    assert y.shape == (batch, seq, hid_dim)
    assert jnp.allclose(y, y_ref, atol=1e-5, rtol=1e-5), "resident path mismatch"

    # 2) Streamed-weights path: force it with a pf big enough for 2 pf chunks
    #    so the accumulate-over-reduction-axis logic is exercised.
    pf_dim2 = 256
    w1b = jax.random.normal(kw1, (hid_dim, pf_dim2), dtype=jnp.float32) * 0.05
    b1b = jax.random.normal(kb1, (pf_dim2,), dtype=jnp.float32) * 0.05
    w2b = jax.random.normal(kw2, (pf_dim2, hid_dim), dtype=jnp.float32) * 0.05
    y2 = jax.block_until_ready(
        positionwise_feedforward(x, w1b, b1b, w2b, b2, tpf=128, force_streamed=True))
    y2_ref = reference_ffn(x, w1b, b1b, w2b, b2)
    assert jnp.allclose(y2, y2_ref, atol=1e-5, rtol=1e-5), "streamed path mismatch"

    print("KERNEL_OK")
</pallas_src>

<mosaic_0001>
module attributes {stable_mosaic.version = 11 : i64} {
  func.func @_ffn_resident_kernel(%arg0: i32, %arg1: memref<8x128xf32, #tpu.memory_space<vmem>>, %arg2: memref<128x128xf32, #tpu.memory_space<vmem>>, %arg3: memref<1x128xf32, #tpu.memory_space<vmem>>, %arg4: memref<128x128xf32, #tpu.memory_space<vmem>>, %arg5: memref<1x128xf32, #tpu.memory_space<vmem>>, %arg6: memref<8x128xf32, #tpu.memory_space<vmem>>) attributes {dimension_semantics = [#tpu.dimension_semantics<parallel>], iteration_bounds = array<i64: 2>, scalar_prefetch = 0 : i64, scratch_operands = 0 : i64, tpu.core_type = #tpu.core_type<tc>, window_params = [{transform_indices = @transform_0, window_bounds = array<i64: 8, 128>}, {pipeline_mode = #tpu.pipeline_mode<synchronous>, transform_indices = @transform_1, window_bounds = array<i64: 128, 128>}, {pipeline_mode = #tpu.pipeline_mode<synchronous>, transform_indices = @transform_2, window_bounds = array<i64: 1, 128>}, {pipeline_mode = #tpu.pipeline_mode<synchronous>, transform_indices = @transform_3, window_bounds = array<i64: 128, 128>}, {pipeline_mode = #tpu.pipeline_mode<synchronous>, transform_indices = @transform_4, window_bounds = array<i64: 1, 128>}, {transform_indices = @transform_5, window_bounds = array<i64: 8, 128>}]} {
    %c0 = arith.constant 0 : index
    %c0_0 = arith.constant 0 : index
    %0 = vector.load %arg1[%c0, %c0_0] : memref<8x128xf32, #tpu.memory_space<vmem>>, vector<8x128xf32>
    %c0_1 = arith.constant 0 : index
    %c0_2 = arith.constant 0 : index
    %1 = vector.load %arg2[%c0_1, %c0_2] : memref<128x128xf32, #tpu.memory_space<vmem>>, vector<128x128xf32>
    %cst = arith.constant dense<0.000000e+00> : vector<8x128xf32>
    %2 = tpu.matmul %0, %1, %cst {dimension_numbers = #tpu.dot_dimension_numbers<[1], [0], [0], [1], [0, 0, 1, 1], [], []>} : vector<8x128xf32>, vector<128x128xf32>, vector<8x128xf32> -> vector<8x128xf32>
    %c0_3 = arith.constant 0 : index
    %c0_4 = arith.constant 0 : index
    %3 = vector.load %arg3[%c0_3, %c0_4] : memref<1x128xf32, #tpu.memory_space<vmem>>, vector<1x128xf32>
    %4 = vector.broadcast %3 : vector<1x128xf32> to vector<8x128xf32>
    %5 = arith.addf %2, %4 : vector<8x128xf32>
    %cst_5 = arith.constant 0.000000e+00 : f32
    %6 = vector.broadcast %cst_5 : f32 to vector<8x128xf32>
    %7 = arith.maximumf %5, %6 : vector<8x128xf32>
    %c0_6 = arith.constant 0 : index
    %c0_7 = arith.constant 0 : index
    %8 = vector.load %arg4[%c0_6, %c0_7] : memref<128x128xf32, #tpu.memory_space<vmem>>, vector<128x128xf32>
    %cst_8 = arith.constant dense<0.000000e+00> : vector<8x128xf32>
    %9 = tpu.matmul %7, %8, %cst_8 {dimension_numbers = #tpu.dot_dimension_numbers<[1], [0], [0], [1], [0, 0, 1, 1], [], []>} : vector<8x128xf32>, vector<128x128xf32>, vector<8x128xf32> -> vector<8x128xf32>
    %c0_9 = arith.constant 0 : index
    %c0_10 = arith.constant 0 : index
    %10 = vector.load %arg5[%c0_9, %c0_10] : memref<1x128xf32, #tpu.memory_space<vmem>>, vector<1x128xf32>
    %11 = vector.broadcast %10 : vector<1x128xf32> to vector<8x128xf32>
    %12 = arith.addf %9, %11 : vector<8x128xf32>
    %c0_11 = arith.constant 0 : index
    %c0_12 = arith.constant 0 : index
    %13 = vector.load %arg6[%c0_11, %c0_12] : memref<8x128xf32, #tpu.memory_space<vmem>>, vector<8x128xf32>
    tpu.vector_store %arg6[%c0_11, %c0_12], %12 {strides = array<i32>} : memref<8x128xf32, #tpu.memory_space<vmem>>, vector<8x128xf32>,
    return
  }
  func.func @transform_0(%arg0: i32) -> (i32, i32) {
    %c0_i32 = arith.constant 0 : i32
    %c0_i32_0 = arith.constant 0 : i32
    return %arg0, %c0_i32 : i32, i32
  }
  func.func @transform_1(%arg0: i32) -> (i32, i32) {
    %c0_i32 = arith.constant 0 : i32
    %c0_i32_0 = arith.constant 0 : i32
    %c0_i32_1 = arith.constant 0 : i32
    return %c0_i32, %c0_i32_0 : i32, i32
  }
  func.func @transform_2(%arg0: i32) -> (i32, i32) {
    %c0_i32 = arith.constant 0 : i32
    %c0_i32_0 = arith.constant 0 : i32
    %c0_i32_1 = arith.constant 0 : i32
    return %c0_i32, %c0_i32_0 : i32, i32
  }
  func.func @transform_3(%arg0: i32) -> (i32, i32) {
    %c0_i32 = arith.constant 0 : i32
    %c0_i32_0 = arith.constant 0 : i32
    %c0_i32_1 = arith.constant 0 : i32
    return %c0_i32, %c0_i32_0 : i32, i32
  }
  func.func @transform_4(%arg0: i32) -> (i32, i32) {
    %c0_i32 = arith.constant 0 : i32
    %c0_i32_0 = arith.constant 0 : i32
    %c0_i32_1 = arith.constant 0 : i32
    return %c0_i32, %c0_i32_0 : i32, i32
  }
  func.func @transform_5(%arg0: i32) -> (i32, i32) {
    %c0_i32 = arith.constant 0 : i32
    %c0_i32_0 = arith.constant 0 : i32
    return %arg0, %c0_i32 : i32, i32
  }
}

</mosaic_0001>

<bundles_post_ra>
// kernel: _ffn_impl.1
= control target key start
LH: loop header
LB: loop body
LE: loop exit
PB: predicated region body
PF: predicated region fallthrough
CT: control target
= control target key end

     0   :  { %s677_s18 = smov 0   ;;  %s819_s0 = inlined_call_operand.vmem [shape: f32[16,128], index: 0, kind: input, shape index: {}]   ;;  %s820_s1 = inlined_call_operand.vmem [shape: f32[128,128], index: 1, kind: input, shape index: {}]   ;;  %s821_s2 = inlined_call_operand.vmem [shape: f32[1,128], index: 2, kind: input, shape index: {}]   ;;  %s822_s3 = inlined_call_operand.vmem [shape: f32[128,128], index: 3, kind: input, shape index: {}]   ;;  %s823_s4 = inlined_call_operand.vmem [shape: f32[1,128], index: 4, kind: input, shape index: {}]   ;;  %s824_s5 = inlined_call_operand.vmem [shape: f32[16,128], index: 5, kind: output, shape index: {}]  }
   0x1 LB: > { %s462_s19 = sadd.s32 4294967295, %s642_s18   ;;  %p466_p0 = scmp.ge.s32.totalorder %s642_s18, 1  ;;  %s642_s18 = sphi %s677_s18, %s15_s18  }
   0x2   : > { %p186_p1 = scmp.lt.s32.totalorder %s642_s18, 3 }
   0x4   : > { %p187_p2 = pnand %p466_p0, %p186_p1 }
   0x5   : > { %v221_v0 = vld [vmem:[%s820_s1] sm:$0xff] (!%p187_p2)  ;;  %v222_v1 = vld [vmem:[%s820_s1 + $0x8] sm:$0xff] (!%p187_p2)  ;;  %v223_v2 = vld [vmem:[%s820_s1 + $0x10] sm:$0xff] (!%p187_p2)  ;;  %v644_v3 = vmov (!%p187_p2), 0.0|0.0   ;;  %vm645_vm0 = vmmov (!%p187_p2), 0   ;;  %v646_v6 = vmov (!%p187_p2), 0.0  }
   0x6   : > { %190 = sbr.rel (%p187_p2) target bundleno = 470 (0x1d6), region = 40  ;;  %577 = vmatprep.subr.bf16.mxu0 (!%p187_p2), %v644_v3  ;;  %v578_v4 = vpack.c.bf16 (!%p187_p2), %v222_v1, %v221_v0  ;;  %v224_v5 = vld [vmem:[%s820_s1 + $0x18] sm:$0xff] (!%p187_p2)  ;;  %539 = vmatprep.mubr.msk.f32.mxu0 (!%p187_p2), %vm645_vm0, %v646_v6  ;;  %v225_v8 = vld [vmem:[%s820_s1 + $0x20] sm:$0xff] (!%p187_p2)  ;;  %v226_v9 = vld [vmem:[%s820_s1 + $0x28] sm:$0xff] (!%p187_p2)  ;;  %p212_p3 = scmp.lt.s32.totalorder (!%p187_p2), %s462_s19, 1 }
   0x7   : > { %601 = vmatprep.subr.bf16.mxu1 (!%p187_p2), %v644_v3  ;;  %574 = vmatprep.mubr.msk.f32.mxu1 (!%p187_p2), %vm645_vm0, %v646_v6  ;;  %v581_v7 = vpack.c.bf16 (!%p187_p2), %v224_v5, %v223_v2  ;;  %v315_v10 = vld [vmem:[%s822_s3] sm:$0xff] (!%p187_p2)  ;;  %v316_v11 = vld [vmem:[%s822_s3 + $0x8] sm:$0xff] (!%p187_p2)  ;;  %v317_v13 = vld [vmem:[%s822_s3 + $0x10] sm:$0xff] (!%p187_p2)  ;;  %v584_v15 = vpack.c.bf16 (!%p187_p2), %v226_v9, %v225_v8 }
   0x8   : > { %579 = vmatpush3.bf16.msra.mxu0 (!%p187_p2), %v578_v4  ;;  %v602_v12 = vpack.c.bf16 (!%p187_p2), %v316_v11, %v315_v10  ;;  %v318_v14 = vld [vmem:[%s822_s3 + $0x18] sm:$0xff] (!%p187_p2)  ;;  %v227_v16 = vld [vmem:[%s820_s1 + $0x30] sm:$0xff] (!%p187_p2)  ;;  %v319_v19 = vld [vmem:[%s822_s3 + $0x20] sm:$0xff] (!%p187_p2) }
   0x9   : > { %580 = vmatprep.subr.bf16.mxu0 (!%p187_p2), %v644_v3  ;;  %v228_v17 = vld [vmem:[%s820_s1 + $0x38] sm:$0xff] (!%p187_p2)  ;;  %v605_v18 = vpack.c.bf16 (!%p187_p2), %v318_v14, %v317_v13  ;;  %v320_v20 = vld [vmem:[%s822_s3 + $0x28] sm:$0xff] (!%p187_p2)  ;;  %v229_v22 = vld [vmem:[%s820_s1 + $0x40] sm:$0xff] (!%p187_p2) }
   0xa   : > { %603 = vmatpush3.bf16.msra.mxu1 (!%p187_p2), %v602_v12  ;;  %v587_v21 = vpack.c.bf16 (!%p187_p2), %v228_v17, %v227_v16  ;;  %v230_v23 = vld [vmem:[%s820_s1 + $0x48] sm:$0xff] (!%p187_p2)  ;;  %v608_v24 = vpack.c.bf16 (!%p187_p2), %v320_v20, %v319_v19  ;;  %v321_v25 = vld [vmem:[%s822_s3 + $0x30] sm:$0xff] (!%p187_p2)  ;;  %v322_v26 = vld [vmem:[%s822_s3 + $0x38] sm:$0xff] (!%p187_p2) }
   0xb   : > { %604 = vmatprep.subr.bf16.mxu1 (!%p187_p2), %v644_v3  ;;  %v590_v27 = vpack.c.bf16 (!%p187_p2), %v230_v23, %v229_v22  ;;  %v231_v28 = vld [vmem:[%s820_s1 + $0x50] sm:$0xff] (!%p187_p2)  ;;  %v232_v29 = vld [vmem:[%s820_s1 + $0x58] sm:$0xff] (!%p187_p2)  ;;  %v611_v30 = vpack.c.bf16 (!%p187_p2), %v322_v26, %v321_v25  ;;  %v323_v31 = vld [vmem:[%s822_s3 + $0x40] sm:$0xff] (!%p187_p2) }
   0xc   : > { %582 = vmatpush3.bf16.msra.mxu0 (!%p187_p2), %v581_v7  ;;  %v324_v32 = vld [vmem:[%s822_s3 + $0x48] sm:$0xff] (!%p187_p2)  ;;  %v593_v33 = vpack.c.bf16 (!%p187_p2), %v232_v29, %v231_v28  ;;  %v233_v34 = vld [vmem:[%s820_s1 + $0x60] sm:$0xff] (!%p187_p2)  ;;  %v325_v37 = vld [vmem:[%s822_s3 + $0x50] sm:$0xff] (!%p187_p2) }
   0xd   : > { %583 = vmatprep.subr.bf16.mxu0 %v644_v3  ;;  %v234_v35 = vld [vmem:[%s820_s1 + $0x68] sm:$0xff]  ;;  %v614_v36 = vpack.c.bf16 %v324_v32, %v323_v31  ;;  %s826_s19 = smov (!%p212_p3, %s462_s19), 1  ;;  %v326_v38 = vld [vmem:[%s822_s3 + $0x58] sm:$0xff]  ;;  %v235_v40 = vld [vmem:[%s820_s1 + $0x70] sm:$0xff] }
   0xe   : > { %606 = vmatpush3.bf16.msra.mxu1 %v605_v18  ;;  %v596_v39 = vpack.c.bf16 %v234_v35, %v233_v34  ;;  %v236_v41 = vld [vmem:[%s820_s1 + $0x78] sm:$0xff]  ;;  %v617_v42 = vpack.c.bf16 %v326_v38, %v325_v37  ;;  %s467_s30 = sshll.u32 %s826_s19, 3  ;;  %v327_v43 = vld [vmem:[%s822_s3 + $0x60] sm:$0xff]  ;;  %v328_v44 = vld [vmem:[%s822_s3 + $0x68] sm:$0xff] }
   0xf   : > { %607 = vmatprep.subr.bf16.mxu1 %v644_v3  ;;  %v599_v45 = vpack.c.bf16 %v236_v41, %v235_v40  ;;  %s215_s12 = scalar_lea.vmem %s819_s0, %s467_s30  ;;  %v620_v46 = vpack.c.bf16 %v328_v44, %v327_v43  ;;  %v329_v48 = vld [vmem:[%s822_s3 + $0x70] sm:$0xff]  ;;  %v330_v49 = vld [vmem:[%s822_s3 + $0x78] sm:$0xff]  ;;  %v469_v51 = vld [vmem:[%s821_s2] ss:$0 sm:$0xff]  ;;  %s219_s24 = scalar_lea.vmem %s824_s5, %s467_s30 }
  0x10   : > { %585 = vmatpush3.bf16.msra.mxu0 %v584_v15  ;;  %v220_v47 = vld [vmem:[%s215_s12] sm:$0xff]  ;;  %v623_v50 = vpack.c.bf16 %v330_v49, %v329_v48 }
  0x11   : > { %586 = vmatprep.subr.bf16.mxu0 %v644_v3  ;;  %v470_v56 = vld [vmem:[%s823_s4] ss:$0 sm:$0xff] }
  0x12   : > { %609 = vmatpush3.bf16.msra.mxu1 %v608_v24 }
  0x13   : > { %610 = vmatprep.subr.bf16.mxu1 %v644_v3 }
  0x14   : > { %588 = vmatpush3.bf16.msra.mxu0 %v587_v21 }
  0x15   : > { %589 = vmatprep.subr.bf16.mxu0 %v644_v3 }
  0x16   : > { %612 = vmatpush3.bf16.msra.mxu1 %v611_v30 }
  0x17   : > { %613 = vmatprep.subr.bf16.mxu1 %v644_v3 }
  0x18   : > { %591 = vmatpush3.bf16.msra.mxu0 %v590_v27 }
  0x19   : > { %592 = vmatprep.subr.bf16.mxu0 %v644_v3 }
  0x1a   : > { %615 = vmatpush3.bf16.msra.mxu1 %v614_v36 }
  0x1b   : > { %616 = vmatprep.subr.bf16.mxu1 %v644_v3 }
  0x1c   : > { %594 = vmatpush3.bf16.msra.mxu0 %v593_v33 }
  0x1d   : > { %595 = vmatprep.subr.bf16.mxu0 %v644_v3 }
  0x1e   : > { %618 = vmatpush3.bf16.msra.mxu1 %v617_v42 }
  0x1f   : > { %619 = vmatprep.subr.bf16.mxu1 %v644_v3 }
  0x20   : > { %597 = vmatpush3.bf16.msra.mxu0 %v596_v39 }
  0x21   : > { %598 = vmatprep.subr.bf16.mxu0 %v644_v3 }
  0x22   : > { %621 = vmatpush3.bf16.msra.mxu1 %v620_v46 }
  0x23   : > { %622 = vmatprep.subr.bf16.mxu1 %v644_v3 }
  0x24   : > { %600 = vmatpush3.bf16.msra.mxu0 %v599_v45 }
  0x26   : > { %624 = vmatpush3.bf16.msra.mxu1 %v623_v50 }
  0x27   : > { %540 = vmatmul.mubr.f32.vlgmr.msra.gmra.mrb[0].mxu0 %v220_v47 }
  0xfa   : > { %v310_v52 = vpop.f32.mrb[0].mxu0 }
  0xfb   : > { %v311_v53 = vadd.f32 %v469_v51, %v310_v52  ;;  %v541_v54 = vpop.f32.mrb[1].mxu0 }
  0xfd   : > { %v314_v55 = vmax.f32 %v311_v53, 0.0 }
  0xff   : > { %575 = vmatmul.mubr.f32.vlgmr.msra.gmra.mrb[0].mxu1 %v314_v55 }
 0x1d2   : > { %v404_v57 = vpop.f32.mrb[0].mxu1 }
 0x1d3   : > { %v405_v58 = vadd.f32 %v470_v56, %v404_v57  ;;  %v576_v59 = vpop.f32.mrb[1].mxu1 }
 0x1d5   : > { %408 = vst [vmem:[%s219_s24] sm:$0xff] %v405_v58 }
 0x1d6 PF: > { %s15_s18 = sadd.s32 1, %s642_s18  }
 0x1d7   : > { %p12_p4 = scmp.ge.s32.totalorder %s15_s18, 4  }
 0x1d9   :  { %14 = sbr.rel (!%p12_p4) target bundleno = 1 (0x1), region = 70 }

</bundles_post_ra>
